<compile_context>
chip_gen: v7x
topology: tpu7x:2x2x1
jax: 0.10.0
libtpu: 0.0.40
codegen_flags: <defaults>
</compile_context>

<pallas_src>
from typing import NamedTuple

import jax
import jax.numpy as jnp
from jax.experimental import pallas as pl
from jax.experimental.pallas import tpu as pltpu

LANE = 128
ROW_ALIGN = 16          # multiple of both f32 (8) and bf16 (16) sublane tiling


def _round_up(x, m):
    return (x + m - 1) // m * m


def _my_atten_kernel(q_ref, k_ref, w1q_ref, w1k_ref, b1_ref,
                     w2q_ref, v_ref, w2v_ref, b2_ref, packed_ref):
    """One (TM, ...) batch tile.

    q_ref     : (TM, Qs)          query rows for this tile (compute dtype)
    k_ref     : (TM, Ks)          key rows for this tile
    w1q_ref   : (Qs, P)           atten.weight.T[:Qs], columns placed at lanes [out, out+V1)
    w1k_ref   : (Ks, P)           atten.weight.T[Qs:], same lane placement
    b1_ref    : (1, P)  f32       atten.bias at lanes [out, out+V1); -inf elsewhere (softmax mask)
    w2q_ref   : (Qs, P)           attn_combin.weight.T[:Qs], columns at lanes [0, out)
    v_ref     : (P, V2)           V[0] rows placed at [out, out+V1); zero elsewhere
    w2v_ref   : (V2, P)           attn_combin.weight.T[Qs:], columns at lanes [0, out)
    b2_ref    : (1, P)  f32       attn_combin.bias at lanes [0, out); zero elsewhere
    packed_ref: (TM, P) f32       lanes [0,out)=result, lanes [out,out+V1)=attention weights
    """
    q = q_ref[...]
    k = k_ref[...]

    # logits live in lanes [out, out+V1); every other lane carries a -inf bias
    # so exp() there is exactly 0 and contributes nothing to the softmax sum.
    logits = (jnp.dot(q, w1q_ref[...], preferred_element_type=jnp.float32)
              + jnp.dot(k, w1k_ref[...], preferred_element_type=jnp.float32)
              + b1_ref[...])

    m = jnp.max(logits, axis=-1, keepdims=True)
    e = jnp.exp(logits - m)
    denom = jnp.sum(e, axis=-1, keepdims=True)
    attn = e * pl.reciprocal(denom, approx=True)       # EUP vrcp; zeros outside [out, out+V1)

    # atten1 = attn @ V  (V rows sit at the same lane offset as attn's nonzeros)
    atten1 = jnp.dot(attn.astype(v_ref.dtype), v_ref[...],
                     preferred_element_type=jnp.float32)             # (TM, V2)
    # result = Q @ W2_q^T + atten1 @ W2_v^T + b2, in lanes [0, out), zero elsewhere
    out = (jnp.dot(q, w2q_ref[...], preferred_element_type=jnp.float32)
           + jnp.dot(atten1.astype(w2v_ref.dtype), w2v_ref[...],
                     preferred_element_type=jnp.float32)
           + b2_ref[...])

    # Pack both user-visible outputs into one unmasked lane-dense store:
    # out's lanes >= out are zero, attn's lanes < out are zero -> plain add.
    packed_ref[...] = (out + attn).astype(packed_ref.dtype)


class MyAttenParams(NamedTuple):
    w1q: jax.Array      # (Qs, P)   compute dtype
    w1k: jax.Array      # (Ks, P)
    b1: jax.Array       # (1, P)    f32, -inf outside the attention lanes
    w2q: jax.Array      # (Qs, P)
    w2v: jax.Array      # (V2, P)
    b2: jax.Array       # (1, P)    f32
    query_size: int
    key_size: int
    value_size1: int
    value_size2: int
    output_size: int
    pack_pad: int
    compute_dtype: jnp.dtype


def prepare_params(w1, b1, w2, b2, query_size, *, compute_dtype=jnp.bfloat16):
    """One-time parameter prep: transpose, split Q/K halves, lane-place, cast.

    Lane layout of the packed 128-wide output:
      lanes [0, output_size)                        -> result rows
      lanes [output_size, output_size+value_size1)  -> attention weights
      remaining lanes                               -> exact zeros
    """
    value_size1, qs_ks = w1.shape
    output_size = w2.shape[0]
    key_size = qs_ks - query_size
    value_size2 = w2.shape[1] - query_size
    pack_pad = _round_up(output_size + value_size1, LANE)
    attn_lo = output_size                     # attention weights start at this lane

    w1_t = jnp.transpose(w1)                  # (Qs+Ks, V1)

    def place_attn_cols(wcols):               # (rows, V1) -> (rows, P) at lanes [out, out+V1)
        return jnp.pad(wcols, ((0, 0), (attn_lo, pack_pad - attn_lo - value_size1)))

    w1q = place_attn_cols(w1_t[:query_size]).astype(compute_dtype)
    w1k = place_attn_cols(w1_t[query_size:]).astype(compute_dtype)
    # -inf bias everywhere except the real attention lanes -> softmax zeros there.
    # Kept in f32 (softmax math is f32) so no inf-in-bf16 edge cases.
    b1_pad = jnp.full((1, pack_pad), -jnp.inf, jnp.float32)
    b1_pad = b1_pad.at[0, attn_lo:attn_lo + value_size1].set(b1.astype(jnp.float32))

    w2_t = jnp.transpose(w2)                  # (Qs+V2, out)
    w2q = jnp.pad(w2_t[:query_size],
                  ((0, 0), (0, pack_pad - output_size))).astype(compute_dtype)
    w2v = jnp.pad(w2_t[query_size:],
                  ((0, 0), (0, pack_pad - output_size))).astype(compute_dtype)
    b2_pad = jnp.pad(b2.astype(jnp.float32), (0, pack_pad - output_size))[None, :]

    return MyAttenParams(w1q, w1k, b1_pad, w2q, w2v, b2_pad,
                         query_size, key_size, value_size1, value_size2,
                         output_size, pack_pad, jnp.dtype(compute_dtype))


def my_atten_forward(Q, K, V, prepared: MyAttenParams, *, block_m=1024):
    """Q:(1,B,Qs)  K:(1,B,Ks)  V:(1,V1,V2) -> (result:(1,B,out), atten_weight:(B,V1))"""
    p = prepared
    q0 = Q[0].astype(p.compute_dtype)
    k0 = K[0].astype(p.compute_dtype)
    v0 = V[0]
    B = q0.shape[0]

    # Batch tile: as large as block_m allows, but capped at ceil(B/2) so the grid
    # has >= 2 steps and v7x's 2 TensorCores both get work ("parallel" axis).
    # On 1-TC chips (v5e/v6e) the extra grid step costs ~0.35us — negligible.
    if B > ROW_ALIGN:
        tm = min(block_m, _round_up(pl.cdiv(B, 2), ROW_ALIGN))
    else:
        tm = ROW_ALIGN
    b_pad = _round_up(B, tm)

    if b_pad != B:
        q0 = jnp.pad(q0, ((0, b_pad - B), (0, 0)))
        k0 = jnp.pad(k0, ((0, b_pad - B), (0, 0)))

    # V rows placed at the same lane offset as the attention weights; tiny pad.
    attn_lo = p.output_size
    v_pad = jnp.pad(v0, ((attn_lo, p.pack_pad - attn_lo - p.value_size1),
                         (0, 0))).astype(p.compute_dtype)

    grid = (b_pad // tm,)

    def row_spec(feat):
        return pl.BlockSpec((tm, feat), lambda i: (i, 0))

    def resident(shape):
        return pl.BlockSpec(shape, lambda i: (0, 0))

    # VMEM limit derived from the actual footprint (double-buffered tiles +
    # resident weights), with generous headroom; well under v7x's 64 MiB.
    isz = jnp.dtype(p.compute_dtype).itemsize
    est = (2 * tm * (p.query_size + p.key_size) * isz          # q + k row tiles
           + 2 * tm * p.pack_pad * 4                           # packed output tile
           + 2 * ((2 * p.query_size + p.key_size + 2 * p.value_size2) * p.pack_pad * isz
                  + 2 * p.pack_pad * 4))                       # resident weights/biases
    vmem_limit = min(32 << 20, max(8 << 20, 4 * est))

    packed = pl.pallas_call(
        _my_atten_kernel,
        out_shape=jax.ShapeDtypeStruct((b_pad, p.pack_pad), jnp.float32),
        grid=grid,
        in_specs=[
            row_spec(p.query_size),          # q, tiled over batch
            row_spec(p.key_size),            # k, tiled over batch
            resident(p.w1q.shape),           # weights / biases / V stay resident
            resident(p.w1k.shape),
            resident(p.b1.shape),
            resident(p.w2q.shape),
            resident(v_pad.shape),
            resident(p.w2v.shape),
            resident(p.b2.shape),
        ],
        out_specs=row_spec(p.pack_pad),      # single lane-dense (multiple of 128) store
        compiler_params=pltpu.CompilerParams(
            dimension_semantics=("parallel",),       # megacore / v7x 2-TC sharding
            vmem_limit_bytes=int(vmem_limit),
        ),
    )(q0, k0, p.w1q, p.w1k, p.b1, p.w2q, v_pad, p.w2v, p.b2)

    # Module semantics require exact shapes, so the two views are sliced back out
    # of the single packed buffer (one buffer instead of two vs the old version).
    result = packed[:B, :p.output_size][None, ...]                        # (1, B, out)
    atten_weight = packed[:B, p.output_size:p.output_size + p.value_size1]  # (B, V1)
    return result, atten_weight


def _reference_forward(Q, K, V, params):
    # Pure-JAX reference mirroring the PyTorch module.
    w1, b1, w2, b2 = params
    qk = jnp.concatenate([Q[0], K[0]], axis=-1)
    attn = jax.nn.softmax(qk @ w1.T + b1, axis=-1)
    atten1 = jnp.einsum("bv,vw->bw", attn, V[0])
    out = jnp.concatenate([Q[0], atten1], axis=-1) @ w2.T + b2
    return out[None, ...], attn


if __name__ == "__main__":
    # Module-consistent sizes; B large enough that the 2-step batch grid does real work.
    B = 256
    query_size = 32
    key_size = 32
    value_size1 = 16
    value_size2 = 32
    output_size = 32

    key = jax.random.PRNGKey(0)
    k_q, k_k, k_v, k_w1, k_b1, k_w2, k_b2 = jax.random.split(key, 7)

    Q = jax.random.normal(k_q, (1, B, query_size), dtype=jnp.float32)
    K = jax.random.normal(k_k, (1, B, key_size), dtype=jnp.float32)
    V = jax.random.normal(k_v, (1, value_size1, value_size2), dtype=jnp.float32)

    # Deterministic synthetic parameters (shapes match nn.Linear in __init__).
    w1 = jax.random.normal(k_w1, (value_size1, query_size + key_size), jnp.float32) * 0.1
    b1 = jax.random.normal(k_b1, (value_size1,), jnp.float32) * 0.1
    w2 = jax.random.normal(k_w2, (output_size, query_size + value_size2), jnp.float32) * 0.1
    b2 = jax.random.normal(k_b2, (output_size,), jnp.float32) * 0.1
    params = (w1, b1, w2, b2)

    ref_result, ref_attn = _reference_forward(Q, K, V, params)

    # f32 path: close parity with the PyTorch module (only the approx softmax
    # reciprocal differs, ~1e-4-level).
    prep_f32 = prepare_params(w1, b1, w2, b2, query_size, compute_dtype=jnp.float32)
    r32, a32 = my_atten_forward(Q, K, V, prep_f32)
    jax.block_until_ready((r32, a32))
    assert r32.shape == (1, B, output_size) and a32.shape == (B, value_size1)
    assert jnp.allclose(r32, ref_result, atol=5e-3, rtol=5e-3)
    assert jnp.allclose(a32, ref_attn, atol=5e-3, rtol=5e-3)

    # Default bf16-MXU path (halved row-tile / weight DMA bytes, f32 accumulation);
    # jitted closure fuses the remaining wrapper glue (cast / pad / slices).
    prep_bf16 = prepare_params(w1, b1, w2, b2, query_size)  # compute_dtype=bfloat16
    fwd_bf16 = jax.jit(lambda q, k, v: my_atten_forward(q, k, v, prep_bf16))
    rbf, abf = fwd_bf16(Q, K, V)
    jax.block_until_ready((rbf, abf))
    assert rbf.shape == (1, B, output_size) and abf.shape == (B, value_size1)
    # Looser tolerance covers bf16 operand rounding (accumulation stays f32).
    assert jnp.allclose(rbf, ref_result, atol=3e-2, rtol=3e-2)
    assert jnp.allclose(abf, ref_attn, atol=3e-2, rtol=3e-2)

    # Tiny odd-batch case exercises the row-padding / single-grid-step path.
    Q_small, K_small = Q[:, :2], K[:, :2]
    r2, a2 = my_atten_forward(Q_small, K_small, V, prep_f32)
    jax.block_until_ready((r2, a2))
    rr2, ra2 = _reference_forward(Q_small, K_small, V, params)
    assert r2.shape == (1, 2, output_size) and a2.shape == (2, value_size1)
    assert jnp.allclose(r2, rr2, atol=5e-3, rtol=5e-3)
    assert jnp.allclose(a2, ra2, atol=5e-3, rtol=5e-3)

    print("KERNEL_OK")
</pallas_src>

<mosaic_0001>
module attributes {stable_mosaic.version = 11 : i64} {
  func.func @_my_atten_kernel(%arg0: i32, %arg1: memref<128x32xf32, #tpu.memory_space<vmem>>, %arg2: memref<128x32xf32, #tpu.memory_space<vmem>>, %arg3: memref<32x128xf32, #tpu.memory_space<vmem>>, %arg4: memref<32x128xf32, #tpu.memory_space<vmem>>, %arg5: memref<1x128xf32, #tpu.memory_space<vmem>>, %arg6: memref<32x128xf32, #tpu.memory_space<vmem>>, %arg7: memref<128x32xf32, #tpu.memory_space<vmem>>, %arg8: memref<32x128xf32, #tpu.memory_space<vmem>>, %arg9: memref<1x128xf32, #tpu.memory_space<vmem>>, %arg10: memref<128x128xf32, #tpu.memory_space<vmem>>) attributes {dimension_semantics = [#tpu.dimension_semantics<parallel>], iteration_bounds = array<i64: 2>, scalar_prefetch = 0 : i64, scratch_operands = 0 : i64, tpu.core_type = #tpu.core_type<tc>, window_params = [{transform_indices = @transform_0, window_bounds = array<i64: 128, 32>}, {transform_indices = @transform_1, window_bounds = array<i64: 128, 32>}, {pipeline_mode = #tpu.pipeline_mode<synchronous>, transform_indices = @transform_2, window_bounds = array<i64: 32, 128>}, {pipeline_mode = #tpu.pipeline_mode<synchronous>, transform_indices = @transform_3, window_bounds = array<i64: 32, 128>}, {pipeline_mode = #tpu.pipeline_mode<synchronous>, transform_indices = @transform_4, window_bounds = array<i64: 1, 128>}, {pipeline_mode = #tpu.pipeline_mode<synchronous>, transform_indices = @transform_5, window_bounds = array<i64: 32, 128>}, {pipeline_mode = #tpu.pipeline_mode<synchronous>, transform_indices = @transform_6, window_bounds = array<i64: 128, 32>}, {pipeline_mode = #tpu.pipeline_mode<synchronous>, transform_indices = @transform_7, window_bounds = array<i64: 32, 128>}, {pipeline_mode = #tpu.pipeline_mode<synchronous>, transform_indices = @transform_8, window_bounds = array<i64: 1, 128>}, {transform_indices = @transform_9, window_bounds = array<i64: 128, 128>}]} {
    %c0 = arith.constant 0 : index
    %c0_0 = arith.constant 0 : index
    %0 = vector.load %arg1[%c0, %c0_0] : memref<128x32xf32, #tpu.memory_space<vmem>>, vector<128x32xf32>
    %c0_1 = arith.constant 0 : index
    %c0_2 = arith.constant 0 : index
    %1 = vector.load %arg2[%c0_1, %c0_2] : memref<128x32xf32, #tpu.memory_space<vmem>>, vector<128x32xf32>
    %c0_3 = arith.constant 0 : index
    %c0_4 = arith.constant 0 : index
    %2 = vector.load %arg3[%c0_3, %c0_4] : memref<32x128xf32, #tpu.memory_space<vmem>>, vector<32x128xf32>
    %cst = arith.constant dense<0.000000e+00> : vector<128x128xf32>
    %3 = tpu.matmul %0, %2, %cst {dimension_numbers = #tpu.dot_dimension_numbers<[1], [0], [0], [1], [0, 0, 1, 1], [], []>} : vector<128x32xf32>, vector<32x128xf32>, vector<128x128xf32> -> vector<128x128xf32>
    %c0_5 = arith.constant 0 : index
    %c0_6 = arith.constant 0 : index
    %4 = vector.load %arg4[%c0_5, %c0_6] : memref<32x128xf32, #tpu.memory_space<vmem>>, vector<32x128xf32>
    %cst_7 = arith.constant dense<0.000000e+00> : vector<128x128xf32>
    %5 = tpu.matmul %1, %4, %cst_7 {dimension_numbers = #tpu.dot_dimension_numbers<[1], [0], [0], [1], [0, 0, 1, 1], [], []>} : vector<128x32xf32>, vector<32x128xf32>, vector<128x128xf32> -> vector<128x128xf32>
    %6 = arith.addf %3, %5 : vector<128x128xf32>
    %c0_8 = arith.constant 0 : index
    %c0_9 = arith.constant 0 : index
    %7 = vector.load %arg5[%c0_8, %c0_9] : memref<1x128xf32, #tpu.memory_space<vmem>>, vector<1x128xf32>
    %8 = vector.broadcast %7 : vector<1x128xf32> to vector<128x128xf32>
    %9 = arith.addf %6, %8 : vector<128x128xf32>
    %cst_10 = arith.constant dense<0xFF800000> : vector<128xf32>
    %10 = vector.multi_reduction <maximumf>, %9, %cst_10 [1] : vector<128x128xf32> to vector<128xf32>
    %11 = vector.shape_cast %10 : vector<128xf32> to vector<128x1xf32>
    %12 = vector.broadcast %11 : vector<128x1xf32> to vector<128x128xf32>
    %13 = arith.subf %9, %12 : vector<128x128xf32>
    %14 = math.exp %13 : vector<128x128xf32>
    %cst_11 = arith.constant dense<0.000000e+00> : vector<128xf32>
    %15 = vector.multi_reduction <add>, %14, %cst_11 [1] : vector<128x128xf32> to vector<128xf32>
    %16 = vector.shape_cast %15 : vector<128xf32> to vector<128x1xf32>
    %17 = tpu.reciprocal %16 {approx = true} : vector<128x1xf32> -> vector<128x1xf32>
    %18 = vector.broadcast %17 : vector<128x1xf32> to vector<128x128xf32>
    %19 = arith.mulf %14, %18 : vector<128x128xf32>
    %c0_12 = arith.constant 0 : index
    %c0_13 = arith.constant 0 : index
    %20 = vector.load %arg7[%c0_12, %c0_13] : memref<128x32xf32, #tpu.memory_space<vmem>>, vector<128x32xf32>
    %cst_14 = arith.constant dense<0.000000e+00> : vector<128x32xf32>
    %21 = tpu.matmul %19, %20, %cst_14 {dimension_numbers = #tpu.dot_dimension_numbers<[1], [0], [0], [1], [0, 0, 1, 1], [], []>} : vector<128x128xf32>, vector<128x32xf32>, vector<128x32xf32> -> vector<128x32xf32>
    %c0_15 = arith.constant 0 : index
    %c0_16 = arith.constant 0 : index
    %22 = vector.load %arg6[%c0_15, %c0_16] : memref<32x128xf32, #tpu.memory_space<vmem>>, vector<32x128xf32>
    %cst_17 = arith.constant dense<0.000000e+00> : vector<128x128xf32>
    %23 = tpu.matmul %0, %22, %cst_17 {dimension_numbers = #tpu.dot_dimension_numbers<[1], [0], [0], [1], [0, 0, 1, 1], [], []>} : vector<128x32xf32>, vector<32x128xf32>, vector<128x128xf32> -> vector<128x128xf32>
    %c0_18 = arith.constant 0 : index
    %c0_19 = arith.constant 0 : index
    %24 = vector.load %arg8[%c0_18, %c0_19] : memref<32x128xf32, #tpu.memory_space<vmem>>, vector<32x128xf32>
    %cst_20 = arith.constant dense<0.000000e+00> : vector<128x128xf32>
    %25 = tpu.matmul %21, %24, %cst_20 {dimension_numbers = #tpu.dot_dimension_numbers<[1], [0], [0], [1], [0, 0, 1, 1], [], []>} : vector<128x32xf32>, vector<32x128xf32>, vector<128x128xf32> -> vector<128x128xf32>
    %26 = arith.addf %23, %25 : vector<128x128xf32>
    %c0_21 = arith.constant 0 : index
    %c0_22 = arith.constant 0 : index
    %27 = vector.load %arg9[%c0_21, %c0_22] : memref<1x128xf32, #tpu.memory_space<vmem>>, vector<1x128xf32>
    %28 = vector.broadcast %27 : vector<1x128xf32> to vector<128x128xf32>
    %29 = arith.addf %26, %28 : vector<128x128xf32>
    %30 = arith.addf %29, %19 : vector<128x128xf32>
    %c0_23 = arith.constant 0 : index
    %c0_24 = arith.constant 0 : index
    %31 = vector.load %arg10[%c0_23, %c0_24] : memref<128x128xf32, #tpu.memory_space<vmem>>, vector<128x128xf32>
    tpu.vector_store %arg10[%c0_23, %c0_24], %30 {strides = array<i32>} : memref<128x128xf32, #tpu.memory_space<vmem>>, vector<128x128xf32>,
    return
  }
  func.func @transform_0(%arg0: i32) -> (i32, i32) {
    %c0_i32 = arith.constant 0 : i32
    %c0_i32_0 = arith.constant 0 : i32
    return %arg0, %c0_i32 : i32, i32
  }
  func.func @transform_1(%arg0: i32) -> (i32, i32) {
    %c0_i32 = arith.constant 0 : i32
    %c0_i32_0 = arith.constant 0 : i32
    return %arg0, %c0_i32 : i32, i32
  }
  func.func @transform_2(%arg0: i32) -> (i32, i32) {
    %c0_i32 = arith.constant 0 : i32
    %c0_i32_0 = arith.constant 0 : i32
    %c0_i32_1 = arith.constant 0 : i32
    return %c0_i32, %c0_i32_0 : i32, i32
  }
  func.func @transform_3(%arg0: i32) -> (i32, i32) {
    %c0_i32 = arith.constant 0 : i32
    %c0_i32_0 = arith.constant 0 : i32
    %c0_i32_1 = arith.constant 0 : i32
    return %c0_i32, %c0_i32_0 : i32, i32
  }
  func.func @transform_4(%arg0: i32) -> (i32, i32) {
    %c0_i32 = arith.constant 0 : i32
    %c0_i32_0 = arith.constant 0 : i32
    %c0_i32_1 = arith.constant 0 : i32
    return %c0_i32, %c0_i32_0 : i32, i32
  }
  func.func @transform_5(%arg0: i32) -> (i32, i32) {
    %c0_i32 = arith.constant 0 : i32
    %c0_i32_0 = arith.constant 0 : i32
    %c0_i32_1 = arith.constant 0 : i32
    return %c0_i32, %c0_i32_0 : i32, i32
  }
  func.func @transform_6(%arg0: i32) -> (i32, i32) {
    %c0_i32 = arith.constant 0 : i32
    %c0_i32_0 = arith.constant 0 : i32
    %c0_i32_1 = arith.constant 0 : i32
    return %c0_i32, %c0_i32_0 : i32, i32
  }
  func.func @transform_7(%arg0: i32) -> (i32, i32) {
    %c0_i32 = arith.constant 0 : i32
    %c0_i32_0 = arith.constant 0 : i32
    %c0_i32_1 = arith.constant 0 : i32
    return %c0_i32, %c0_i32_0 : i32, i32
  }
  func.func @transform_8(%arg0: i32) -> (i32, i32) {
    %c0_i32 = arith.constant 0 : i32
    %c0_i32_0 = arith.constant 0 : i32
    %c0_i32_1 = arith.constant 0 : i32
    return %c0_i32, %c0_i32_0 : i32, i32
  }
  func.func @transform_9(%arg0: i32) -> (i32, i32) {
    %c0_i32 = arith.constant 0 : i32
    %c0_i32_0 = arith.constant 0 : i32
    return %arg0, %c0_i32 : i32, i32
  }
}

</mosaic_0001>

<bundles_post_ra>
// kernel: tpu_custom_call.1
= control target key start
LH: loop header
LB: loop body
LE: loop exit
PB: predicated region body
PF: predicated region fallthrough
CT: control target
= control target key end

     0   :  { %14 = vsyncpa [#allocation3], 0  ;;  %s2924_s0 = inlined_call_operand.vmem [shape: f32[256,32], index: 0, kind: input, shape index: {}]   ;;  %s2925_s1 = inlined_call_operand.vmem [shape: f32[256,32], index: 1, kind: input, shape index: {}]   ;;  %s2926_s2 = inlined_call_operand.vmem [shape: f32[32,128], index: 2, kind: input, shape index: {}]   ;;  %s2927_s3 = inlined_call_operand.vmem [shape: f32[32,128], index: 3, kind: input, shape index: {}]   ;;  %s2928_s4 = inlined_call_operand.vmem [shape: f32[1,128], index: 4, kind: input, shape index: {}]   ;;  %s2929_s5 = inlined_call_operand.vmem [shape: f32[32,128], index: 5, kind: input, shape index: {}]   ;;  %s2930_s6 = inlined_call_operand.vmem [shape: f32[128,32], index: 6, kind: input, shape index: {}]   ;;  %s2931_s7 = inlined_call_operand.vmem [shape: f32[32,128], index: 7, kind: input, shape index: {}]   ;;  %s2932_s8 = inlined_call_operand.vmem [shape: f32[1,128], index: 8, kind: input, shape index: {}]   ;;  %s2933_s9 = inlined_call_operand.hbm [shape: f32[256,128], index: 9, kind: output, shape index: {}]  }
   0x1   :  { %16 = vsyncpa [#allocation3 + $0x1], 0  ;;  %s2299_s30 = smov 0   ;;  %s2301_s10 = smov 0  }
   0x2   :  { %s2303_s11 = smov 0   ;;  %s2305_s12 = smov 0  }
   0x3 LB: > { %s2320_s13 = sadd.s32 4294967295, %s2244_s12   ;;  %s1600_s14 = sadd.s32 4294967294, %s2244_s12   ;;  %s2244_s12 = sphi %s2305_s12, %s2939_s12   ;;  %s2240_s11 = sphi %s2303_s11, %s2938_s11   ;;  %s2236_s10 = sphi %s2301_s10, %s2937_s10   ;;  %s2232_s30 = sphi %s2299_s30, %s2936_s30  }
   0x4   : > { %s2324_s15 = sadd.s32 1, %s2244_s12   ;;  %s228_s16 = sadd.s32 1, %s2240_s11 }
   0x5   : > { %s225_s17 = ssub.s32 %s2244_s12, %s2324_s15  ;;  %p238_p0 = scmp.ne.s32.totalorder %s2240_s11, %s2236_s10 }
   0x6   : > { %p226_p1 = scmp.eq.s32.totalorder %s225_s17, 0  ;;  %p239_p2 = scmp.eq.s32.totalorder %s2320_s13, 1 }
   0x7   : > { %p244_p3 = scmp.ne.s32.totalorder %s2236_s10, %s2232_s30  ;;  %p245_p4 = scmp.eq.s32.totalorder %s1600_s14, 1 }
   0x8   : > { %s2335_s18 = scalar_select %p226_p1, %s2240_s11, %s228_s16  }
   0x9   : > { %p2337_p5 = por %p239_p2, %p238_p0  ;;  %p2341_p6 = por %p245_p4, %p244_p3 }
   0xa   : > { %p1603_p7 = scmp.ge.s32.totalorder %s2244_s12, 1  ;;  %p302_p8 = scmp.lt.s32.totalorder %s2244_s12, 3 }
   0xc   : > { %p303_p9 = pnand %p1603_p7, %p302_p8 }
   0xd   : > { %v392_v0 = vld [vmem:[%s2927_s3] sm:$0xff] (!%p303_p9)  ;;  %v393_v1 = vld [vmem:[%s2927_s3 + $0x8] sm:$0xff] (!%p303_p9)  ;;  %v394_v2 = vld [vmem:[%s2927_s3 + $0x10] sm:$0xff] (!%p303_p9)  ;;  %s1605_s27 = sshll.u32 (!%p303_p9), %s2320_s13, 4  ;;  %vm396_vm0 = vcmask (!%p303_p9), 261120   ;;  %s340_s23 = sand.u32 (!%p303_p9), 1, %s2236_s10  }
   0xe   : > { %306 = sbr.rel (%p303_p9) target bundleno = 1071 (0x42f), region = 56  ;;  %v1977_v3 = vpack.c.bf16 (!%p303_p9), %v393_v1, %v392_v0  ;;  %v395_v4 = vld [vmem:[%s2927_s3 + $0x18] sm:$0xff] (!%p303_p9)  ;;  %p344_p10 = scmp.lt.s32.totalorder (!%p303_p9), %s1605_s27, 31  ;;  %v388_v6 = vld [vmem:[%s2926_s2] sm:$0xff] (!%p303_p9)  ;;  %v389_v7 = vld [vmem:[%s2926_s2 + $0x8] sm:$0xff] (!%p303_p9) }
   0xf   : > { %v1981_v5 = vpack.c.bf16 (!%p303_p9), %v395_v4, %v394_v2  ;;  %v1985_v8 = vpack.c.bf16 (!%p303_p9), %v389_v7, %v388_v6  ;;  %v390_v9 = vld [vmem:[%s2926_s2 + $0x10] sm:$0xff] (!%p303_p9)  ;;  %v391_v10 = vld [vmem:[%s2926_s2 + $0x18] sm:$0xff] (!%p303_p9)  ;;  %v1641_v44 = vld [vmem:[%s2928_s4] ss:$0 sm:$0xff] (!%p303_p9)  ;;  %s1604_s26 = sshll.u32 (!%p303_p9), %s340_s23, 7  ;;  %s1680_s29 = sshll.u32 (!%p303_p9), %s2320_s13, 11 }
  0x10   : > { %1978 = vmatprep.subr.bf16.mxu0 (!%p303_p9), %v1977_v3  ;;  %v1989_v14 = vpack.c.bf16 (!%p303_p9), %v391_v10, %v390_v9  ;;  %s2824_s28 = scalar_lea.vmem (!%p303_p9), [#allocation2], %s1604_s26  ;;  %s2883_s13 = scalar_lea.sflag (!%p303_p9), [#allocation3], %s340_s23 }
  0x11   : > { %1980 = vmatpush3.bf16.msra.mxu0 (!%p303_p9), %v1977_v3  ;;  %s1526_s14 = sshll.u32 (!%p303_p9), %s2824_s28, 4  ;;  %s2876_s14 = int_to_ptr.vmem [resolvable:$true] %s1526_s14 }
  0x12   : > { %1982 = vmatprep.subr.bf16.mxu0 (!%p303_p9), %v1981_v5 }
  0x15   : > { %s2941_s27 = smov (!%p344_p10, %s1605_s27), 31  ;;  %1984 = vmatpush3.bf16.msra.mxu0 %v1981_v5 }
  0x16   : > { %s1606_s22 = sshll.u32 %s2941_s27, 3  ;;  %1986 = vmatprep.subr.bf16.mxu0 %v1985_v8  ;;  %s2182_s27 = scalar_lea.vmem %s2876_s14, 2048 }
  0x17   : > { %s2374_s25 = scalar_lea.vmem %s2925_s1, %s1606_s22  ;;  %s2415_s21 = scalar_lea.vmem %s2924_s0, %s1606_s22 }
  0x18   : > { %v372_v11 = vld [vmem:[%s2374_s25] sm:$0xff]  ;;  %v373_v12 = vld [vmem:[%s2374_s25 + $0x8] sm:$0xff]  ;;  %v374_v13 = vld [vmem:[%s2374_s25 + $0x10] sm:$0xff]  ;;  %p2183_p11 = scmp.ne.s32.totalorder %s2876_s14, %s2182_s27  ;;  %s2246_s22 = smov [#allocation2]  }
  0x19   : > { %1801 = vmatprep.mubr.msk.f32.mxu0 %vm396_vm0, %v372_v11  ;;  %v375_v15 = vld [vmem:[%s2374_s25 + $0x18] sm:$0xff]  ;;  %v376_v16 = vld [vmem:[%s2374_s25 + $0x20] sm:$0xff]  ;;  %v377_v17 = vld [vmem:[%s2374_s25 + $0x28] sm:$0xff]  ;;  %s2186_s24 = sshll.u32 %s2246_s22, 4  ;;  %s2187_s24 = int_to_ptr.vmem [resolvable:$false] %s2186_s24 }
  0x1a   : > { %1802 = vmatmul.mubr.msk.f32.vlgmr.msra.gmra.mrb[0].mxu0 %vm396_vm0, %v373_v12  ;;  %v378_v18 = vld [vmem:[%s2374_s25 + $0x30] sm:$0xff]  ;;  %v379_v19 = vld [vmem:[%s2374_s25 + $0x38] sm:$0xff]  ;;  %v380_v20 = vld [vmem:[%s2374_s25 + $0x40] sm:$0xff]  ;;  %p2184_p12 = pnand %p2183_p11, %p2337_p5  ;;  %p2189_p0 = scmp.lt.s32.totalorder %s2876_s14, %s2187_s24 }
  0x1b   : > { %1988 = vmatpush3.bf16.msra.mxu0 %v1985_v8  ;;  %1804 = vmatprep.mubr.msk.f32.mxu0 %vm396_vm0, %v374_v13  ;;  %v381_v21 = vld [vmem:[%s2374_s25 + $0x48] sm:$0xff]  ;;  %v382_v22 = vld [vmem:[%s2374_s25 + $0x50] sm:$0xff]  ;;  %v383_v23 = vld [vmem:[%s2374_s25 + $0x58] sm:$0xff] }
  0x1c   : > { %1990 = vmatprep.subr.bf16.mxu0 %v1989_v14  ;;  %v384_v24 = vld [vmem:[%s2374_s25 + $0x60] sm:$0xff]  ;;  %v385_v25 = vld [vmem:[%s2374_s25 + $0x68] sm:$0xff]  ;;  %v386_v26 = vld [vmem:[%s2374_s25 + $0x70] sm:$0xff]  ;;  %p2185_p13 = pneg %p2184_p12 }
  0x1d   : > { %v387_v27 = vld [vmem:[%s2374_s25 + $0x78] sm:$0xff]  ;;  %v356_v28 = vld [vmem:[%s2415_s21] sm:$0xff]  ;;  %v2424_v29 = vld [vmem:[%s2415_s21 + $0x8] sm:$0xff]  ;;  %s2188_s25 = scalar_lea.vmem %s2187_s24, 4096 }
  0x1e   : > { %1805 = vmatmul.mubr.msk.f32.gmra.mrb[2].mxu0 %vm396_vm0, %v375_v15  ;;  %v2427_v30 = vld [vmem:[%s2415_s21 + $0x10] sm:$0xff]  ;;  %v2434_v31 = vld [vmem:[%s2415_s21 + $0x18] sm:$0xff]  ;;  %v2437_v32 = vld [vmem:[%s2415_s21 + $0x20] sm:$0xff]  ;;  %p2190_p1 = scmp.lt.s32.totalorder %s2188_s25, %s2182_s27 }
  0x1f   : > { %1807 = vmatprep.mubr.msk.f32.mxu0 %vm396_vm0, %v376_v16  ;;  %1992 = vmatpush3.bf16.msra.mxu0 %v1989_v14  ;;  %v2444_v33 = vld [vmem:[%s2415_s21 + $0x28] sm:$0xff]  ;;  %v2447_v34 = vld [vmem:[%s2415_s21 + $0x30] sm:$0xff]  ;;  %v2454_v35 = vld [vmem:[%s2415_s21 + $0x38] sm:$0xff] }
  0x20   : > { %v2457_v36 = vld [vmem:[%s2415_s21 + $0x40] sm:$0xff]  ;;  %v2464_v37 = vld [vmem:[%s2415_s21 + $0x48] sm:$0xff]  ;;  %v2467_v38 = vld [vmem:[%s2415_s21 + $0x50] sm:$0xff]  ;;  %p2191_p2 = por %p2190_p1, %p2189_p0 }
  0x21   : > { %v2474_v39 = vld [vmem:[%s2415_s21 + $0x58] sm:$0xff]  ;;  %v2477_v40 = vld [vmem:[%s2415_s21 + $0x60] sm:$0xff]  ;;  %v2484_v41 = vld [vmem:[%s2415_s21 + $0x68] sm:$0xff] }
  0x22   : > { %1808 = vmatmul.mubr.msk.f32.gmra.mrb[4].mxu0 %vm396_vm0, %v377_v17  ;;  %v2487_v42 = vld [vmem:[%s2415_s21 + $0x70] sm:$0xff]  ;;  %v2494_v43 = vld [vmem:[%s2415_s21 + $0x78] sm:$0xff]  ;;  %v950_v13 = vld [vmem:[%s2930_s6] sm:$0xff]  ;;  %s2874_s21 = scalar_lea.hbm %s2933_s9, %s1680_s29  ;;  %p2192_p3 = pnand %p2191_p2, %p2185_p13 }
  0x23   : > { %1810 = vmatprep.mubr.msk.f32.mxu0 %vm396_vm0, %v378_v18  ;;  %v951_v14 = vld [vmem:[%s2930_s6 + $0x8] sm:$0xff]  ;;  %v952_v15 = vld [vmem:[%s2930_s6 + $0x10] sm:$0xff]  ;;  %v953_v17 = vld [vmem:[%s2930_s6 + $0x18] sm:$0xff] }
  0x24   : > { %v1993_v16 = vpack.c.bf16 %v951_v14, %v950_v13  ;;  %v1997_v18 = vpack.c.bf16 %v953_v17, %v952_v15 }
  0x26   : > { %1811 = vmatmul.mubr.msk.f32.gmra.mrb[6].mxu0 %vm396_vm0, %v379_v19  ;;  %v954_v19 = vld [vmem:[%s2930_s6 + $0x20] sm:$0xff]  ;;  %1994 = vmatprep.subr.bf16.mxu1 %v1993_v16 }
  0x27   : > { %1813 = vmatprep.mubr.msk.f32.mxu0 %vm396_vm0, %v380_v20  ;;  %v955_v20 = vld [vmem:[%s2930_s6 + $0x28] sm:$0xff]  ;;  %1996 = vmatpush3.bf16.msra.mxu1 %v1993_v16 }
  0x28   : > { %1998 = vmatprep.subr.bf16.mxu1 %v1997_v18 }
  0x2a   : > { %1814 = vmatmul.mubr.msk.f32.gmra.mrb[8].mxu0 %vm396_vm0, %v381_v21  ;;  %v2001_v21 = vpack.c.bf16 %v955_v20, %v954_v19 }
  0x2b   : > { %1816 = vmatprep.mubr.msk.f32.mxu0 %vm396_vm0, %v382_v22  ;;  %v956_v22 = vld [vmem:[%s2930_s6 + $0x30] sm:$0xff]  ;;  %2000 = vmatpush3.bf16.msra.mxu1 %v1997_v18 }
  0x2c   : > { %2002 = vmatprep.subr.bf16.mxu1 %v2001_v21 }
  0x2e   : > { %1817 = vmatmul.mubr.msk.f32.gmra.mrb[10].mxu0 %vm396_vm0, %v383_v23  ;;  %v957_v23 = vld [vmem:[%s2930_s6 + $0x38] sm:$0xff] }
  0x2f   : > { %1819 = vmatprep.mubr.msk.f32.mxu0 %vm396_vm0, %v384_v24  ;;  %v2005_v24 = vpack.c.bf16 %v957_v23, %v956_v22  ;;  %2004 = vmatpush3.bf16.msra.mxu1 %v2001_v21 }
  0x31   : > { %2006 = vmatprep.subr.bf16.mxu1 %v2005_v24 }
  0x32   : > { %1820 = vmatmul.mubr.msk.f32.gmra.mrb[12].mxu0 %vm396_vm0, %v385_v25 }
  0x33   : > { %1822 = vmatprep.mubr.msk.f32.mxu0 %vm396_vm0, %v386_v26  ;;  %2008 = vmatpush3.bf16.msra.mxu1 %v2005_v24 }
  0x36   : > { %1823 = vmatmul.mubr.msk.f32.gmra.mrb[14].mxu0 %vm396_vm0, %v387_v27 }
  0x37   : > { %1833 = vmatprep.mubr.msk.f32.mxu0 %vm396_vm0, %v356_v28 }
  0x3a   : > { %1834 = vmatmul.mubr.msk.f32.vlgmr.msra.gmra.mrb[0].mxu0 %vm396_vm0, %v2424_v29 }
  0x3b   : > { %1836 = vmatprep.mubr.msk.f32.mxu0 %vm396_vm0, %v2427_v30 }
  0x3e   : > { %1837 = vmatmul.mubr.msk.f32.gmra.mrb[2].mxu0 %vm396_vm0, %v2434_v31 }
  0x3f   : > { %1839 = vmatprep.mubr.msk.f32.mxu0 %vm396_vm0, %v2437_v32 }
  0x42   : > { %1840 = vmatmul.mubr.msk.f32.gmra.mrb[4].mxu0 %vm396_vm0, %v2444_v33 }
  0x43   : > { %1842 = vmatprep.mubr.msk.f32.mxu0 %vm396_vm0, %v2447_v34 }
  0x46   : > { %1843 = vmatmul.mubr.msk.f32.gmra.mrb[6].mxu0 %vm396_vm0, %v2454_v35 }
  0x47   : > { %1845 = vmatprep.mubr.msk.f32.mxu0 %vm396_vm0, %v2457_v36 }
  0x4a   : > { %1846 = vmatmul.mubr.msk.f32.gmra.mrb[8].mxu0 %vm396_vm0, %v2464_v37 }
  0x4b   : > { %1848 = vmatprep.mubr.msk.f32.mxu0 %vm396_vm0, %v2467_v38 }
  0x4e   : > { %1849 = vmatmul.mubr.msk.f32.gmra.mrb[10].mxu0 %vm396_vm0, %v2474_v39 }
  0x4f   : > { %1851 = vmatprep.mubr.msk.f32.mxu0 %vm396_vm0, %v2477_v40 }
  0x52   : > { %1852 = vmatmul.mubr.msk.f32.gmra.mrb[12].mxu0 %vm396_vm0, %v2484_v41 }
  0x53   : > { %1854 = vmatprep.mubr.msk.f32.mxu0 %vm396_vm0, %v2487_v42 }
  0x56   : > { %1855 = vmatmul.mubr.msk.f32.gmra.mrb[14].mxu0 %vm396_vm0, %v2494_v43 }
  0x57   : > { %1953 = vmatprep.mubr.msk.f32.mxu0 %vm396_vm0, %v356_v28 }
 0x10d   : > { %v1835_v45 = vpop.f32.mrb[0].mxu0 }
 0x10e   : > { %v704_v46 = vpop.f32.mrb[1].mxu0  ;;  %v2505_v50 = vadd.f32 %v1835_v45, %v1641_v44 }
 0x10f   : > { %v2502_v47 = vadd.f32 %v1641_v44, %v704_v46 }
 0x111   : > { %806 = vmax.xlane.f32.xlu0 %v2502_v47  ;;  %v1838_v48 = vpop.f32.mrb[2].mxu0 }
 0x112   : > { %v714_v49 = vpop.f32.mrb[3].mxu0  ;;  %v2511_v54 = vadd.f32 %v1838_v48, %v1641_v44 }
 0x113   : > { %v2507_v51 = vadd.f32 %v1641_v44, %v714_v49 }
 0x115   : > { %808 = vmax.xlane.f32.xlu0 %v2505_v50  ;;  %810 = vmax.xlane.f32.xlu1 %v2507_v51  ;;  %v1841_v52 = vpop.f32.mrb[4].mxu0 }
 0x116   : > { %v724_v53 = vpop.f32.mrb[5].mxu0  ;;  %v2517_v58 = vadd.f32 %v1841_v52, %v1641_v44 }
 0x117   : > { %v2513_v55 = vadd.f32 %v1641_v44, %v724_v53 }
 0x119   : > { %812 = vmax.xlane.f32.xlu1 %v2511_v54  ;;  %814 = vmax.xlane.f32.xlu0 %v2513_v55  ;;  %v1844_v56 = vpop.f32.mrb[6].mxu0 }
 0x11a   : > { %v734_v57 = vpop.f32.mrb[7].mxu0  ;;  %v2523_v62 = vadd.f32 %v1844_v56, %v1641_v44 }
 0x11b   : > { %v2519_v59 = vadd.f32 %v1641_v44, %v734_v57 }
 0x11d   : > { %816 = vmax.xlane.f32.xlu1 %v2517_v58  ;;  %818 = vmax.xlane.f32.xlu0 %v2519_v59  ;;  %v1847_v60 = vpop.f32.mrb[8].mxu0 }
 0x11e   : > { %v744_v61 = vpop.f32.mrb[9].mxu0  ;;  %v2529_v2 = vadd.f32 %v1847_v60, %v1641_v44 }
 0x11f   : > { %v2525_v63 = vadd.f32 %v1641_v44, %v744_v61 }
 0x121   : > { %820 = vmax.xlane.f32.xlu1 %v2523_v62  ;;  %822 = vmax.xlane.f32.xlu0 %v2525_v63  ;;  %v1850_v0 = vpop.f32.mrb[10].mxu0 }
 0x122   : > { %v754_v1 = vpop.f32.mrb[11].mxu0  ;;  %v2535_v6 = vadd.f32 %v1850_v0, %v1641_v44 }
 0x123   : > { %v2531_v3 = vadd.f32 %v1641_v44, %v754_v1 }
 0x125   : > { %824 = vmax.xlane.f32.xlu1 %v2529_v2  ;;  %826 = vmax.xlane.f32.xlu0 %v2531_v3  ;;  %v1853_v4 = vpop.f32.mrb[12].mxu0 }
 0x126   : > { %v764_v5 = vpop.f32.mrb[13].mxu0  ;;  %v2541_v10 = vadd.f32 %v1853_v4, %v1641_v44 }
 0x127   : > { %v2537_v7 = vadd.f32 %v1641_v44, %v764_v5 }
 0x129   : > { %828 = vmax.xlane.f32.xlu1 %v2535_v6  ;;  %830 = vmax.xlane.f32.xlu0 %v2537_v7  ;;  %v1856_v8 = vpop.f32.mrb[14].mxu0 }
 0x12a   : > { %v774_v9 = vpop.f32.mrb[15].mxu0  ;;  %v2547_v12 = vadd.f32 %v1856_v8, %v1641_v44 }
 0x12b   : > { %v2543_v11 = vadd.f32 %v1641_v44, %v774_v9 }
 0x12d   : > { %832 = vmax.xlane.f32.xlu1 %v2541_v10  ;;  %834 = vmax.xlane.f32.xlu0 %v2543_v11 }
 0x131   : > { %836 = vmax.xlane.f32.xlu1 %v2547_v12 }
 0x19e   : > { %v807_v25 = vpop.xlane.xlu0 %806 }
 0x19f   : > { %v838_v26 = vsub.f32 %v2502_v47, %v807_v25 }
 0x1a1   : > { %v854_v27 = vmul.f32 1.442695, %v838_v26 }
 0x1a2   : > { %v809_v28 = vpop.xlane.xlu0 %808  ;;  %v811_v44 = vpop.xlane.xlu1 %810 }
 0x1a3   : > { %2118 = vpow2.f32 %v854_v27  ;;  %v839_v45 = vsub.f32 %v2505_v50, %v809_v28  ;;  %v840_v46 = vsub.f32 %v2507_v51, %v811_v44 }
 0x1a5   : > { %v856_v48 = vmul.f32 1.442695, %v839_v45  ;;  %v858_v49 = vmul.f32 1.442695, %v840_v46  ;;  %v959_v45 = vld [vmem:[%s2930_s6 + $0x48] sm:$0xff] }
 0x1a6   : > { %v813_v52 = vpop.xlane.xlu1 %812  ;;  %v815_v53 = vpop.xlane.xlu0 %814 }
 0x1a7   : > { %2120 = vpow2.f32 %v856_v48  ;;  %v841_v56 = vsub.f32 %v2511_v54, %v813_v52  ;;  %v842_v57 = vsub.f32 %v2513_v55, %v815_v53 }
 0x1a8   : > { %2122 = vpow2.f32 %v858_v49 }
 0x1a9   : > { %v860_v60 = vmul.f32 1.442695, %v841_v56  ;;  %v862_v47 = vmul.f32 1.442695, %v842_v57  ;;  %v960_v56 = vld [vmem:[%s2930_s6 + $0x50] sm:$0xff]  ;;  %v961_v57 = vld [vmem:[%s2930_s6 + $0x58] sm:$0xff] }
 0x1aa   : > { %v817_v61 = vpop.xlane.xlu1 %816  ;;  %v819_v0 = vpop.xlane.xlu0 %818 }
 0x1ab   : > { %2124 = vpow2.f32 %v860_v60  ;;  %v843_v1 = vsub.f32 %v2517_v58, %v817_v61  ;;  %v844_v50 = vsub.f32 %v2519_v59, %v819_v0  ;;  %v2013_v60 = vpack.c.bf16 %v961_v57, %v960_v56 }
 0x1ac   : > { %2126 = vpow2.f32 %v862_v47 }
 0x1ad   : > { %v2581_v51 = vpop.eup %2118  ;;  %v864_v4 = vmul.f32 1.442695, %v843_v1  ;;  %v866_v5 = vmul.f32 1.442695, %v844_v50  ;;  %v963_v1 = vld [vmem:[%s2930_s6 + $0x68] sm:$0xff] }
 0x1ae   : > { %v821_v8 = vpop.xlane.xlu1 %820  ;;  %v823_v9 = vpop.xlane.xlu0 %822  ;;  %886 = vadd.xlane.f32.xlu0 %v2581_v51 }
 0x1af   : > { %2128 = vpow2.f32 %v864_v4  ;;  %v845_v54 = vsub.f32 %v2523_v62, %v821_v8  ;;  %v846_v55 = vsub.f32 %v2525_v63, %v823_v9  ;;  %v964_v8 = vld [vmem:[%s2930_s6 + $0x70] sm:$0xff]  ;;  %v965_v9 = vld [vmem:[%s2930_s6 + $0x78] sm:$0xff] }
 0x1b0   : > { %2130 = vpow2.f32 %v866_v5 }
 0x1b1   : > { %v2586_v13 = vpop.eup %2120  ;;  %v868_v58 = vmul.f32 1.442695, %v845_v54  ;;  %v870_v14 = vmul.f32 1.442695, %v846_v55  ;;  %v2021_v54 = vpack.c.bf16 %v965_v9, %v964_v8 }
 0x1b2   : > { %v2588_v59 = vpop.eup %2122  ;;  %v825_v15 = vpop.xlane.xlu1 %824  ;;  %888 = vadd.xlane.f32.xlu1 %v2586_v13 }
 0x1b3   : > { %v827_v16 = vpop.xlane.xlu0 %826  ;;  %2132 = vpow2.f32 %v868_v58  ;;  %v847_v17 = vsub.f32 %v2529_v2, %v825_v15  ;;  %890 = vadd.xlane.f32.xlu0 %v2588_v59  ;;  %v1115_v15 = vld [vmem:[%s2931_s7] sm:$0xff] }
 0x1b4   : > { %v848_v18 = vsub.f32 %v2531_v3, %v827_v16  ;;  %2134 = vpow2.f32 %v870_v14  ;;  %v1116_v16 = vld [vmem:[%s2931_s7 + $0x8] sm:$0xff] }
 0x1b5   : > { %v2594_v62 = vpop.eup %2124  ;;  %v872_v63 = vmul.f32 1.442695, %v847_v17  ;;  %v1111_v17 = vld [vmem:[%s2929_s5] sm:$0xff] }
 0x1b6   : > { %v874_v19 = vmul.f32 1.442695, %v848_v18  ;;  %v2596_v20 = vpop.eup %2126  ;;  %v829_v21 = vpop.xlane.xlu1 %828  ;;  %892 = vadd.xlane.f32.xlu1 %v2594_v62  ;;  %v2025_v18 = vpack.c.bf16 %v1116_v16, %v1115_v15 }
 0x1b7   : > { %v831_v22 = vpop.xlane.xlu0 %830  ;;  %2136 = vpow2.f32 %v872_v63  ;;  %v849_v23 = vsub.f32 %v2535_v6, %v829_v21  ;;  %894 = vadd.xlane.f32.xlu0 %v2596_v20  ;;  %v1112_v63 = vld [vmem:[%s2929_s5 + $0x8] sm:$0xff]  ;;  %v1113_v21 = vld [vmem:[%s2929_s5 + $0x10] sm:$0xff] }
 0x1b8   : > { %v850_v2 = vsub.f32 %v2537_v7, %v831_v22  ;;  %2138 = vpow2.f32 %v874_v19  ;;  %v958_v7 = vld [vmem:[%s2930_s6 + $0x40] sm:$0xff]  ;;  %v2674_v19 = vpack.c.bf16 %v1112_v63, %v1111_v17  ;;  %v1114_v22 = vld [vmem:[%s2929_s5 + $0x18] sm:$0xff] }
 0x1b9   : > { %v2602_v3 = vpop.eup %2128  ;;  %v876_v24 = vmul.f32 1.442695, %v849_v23  ;;  %v2009_v46 = vpack.c.bf16 %v959_v45, %v958_v7  ;;  %v2682_v23 = vpack.c.bf16 %v1114_v22, %v1113_v21 }
 0x1ba   : > { %v878_v25 = vmul.f32 1.442695, %v850_v2  ;;  %v2604_v26 = vpop.eup %2130  ;;  %v833_v27 = vpop.xlane.xlu1 %832  ;;  %896 = vadd.xlane.f32.xlu1 %v2602_v3  ;;  %2034 = vmatprep.subr.bf16.mxu0 %v2674_v19 }
 0x1bb   : > { %v835_v28 = vpop.xlane.xlu0 %834  ;;  %2140 = vpow2.f32 %v876_v24  ;;  %v851_v44 = vsub.f32 %v2541_v10, %v833_v27  ;;  %898 = vadd.xlane.f32.xlu0 %v2604_v26  ;;  %2010 = vmatprep.subr.bf16.mxu1 %v2009_v46 }
 0x1bc   : > { %v852_v6 = vsub.f32 %v2543_v11, %v835_v28  ;;  %2142 = vpow2.f32 %v878_v25  ;;  %2012 = vmatpush3.bf16.msra.mxu1 %v2009_v46  ;;  %2036 = vmatpush3.bf16.msra.mxu0 %v2674_v19 }
 0x1bd   : > { %v2616_v48 = vpop.eup %2132  ;;  %v880_v49 = vmul.f32 1.442695, %v851_v44  ;;  %2014 = vmatprep.subr.bf16.mxu1 %v2013_v60  ;;  %2038 = vmatprep.subr.bf16.mxu0 %v2682_v23 }
 0x1be   : > { %v882_v52 = vmul.f32 1.442695, %v852_v6  ;;  %v2618_v53 = vpop.eup %2134  ;;  %900 = vadd.xlane.f32.xlu1 %v2616_v48  ;;  %v837_v10 = vpop.xlane.xlu1 %836 }
 0x1bf   : > { %2144 = vpow2.f32 %v880_v49  ;;  %v853_v11 = vsub.f32 %v2547_v12, %v837_v10  ;;  %902 = vadd.xlane.f32.xlu0 %v2618_v53  ;;  %v962_v12 = vld [vmem:[%s2930_s6 + $0x60] sm:$0xff] }
 0x1c0   : > { %2146 = vpow2.f32 %v882_v52  ;;  %2016 = vmatpush3.bf16.msra.mxu1 %v2013_v60  ;;  %v2017_v50 = vpack.c.bf16 %v963_v1, %v962_v12  ;;  %2040 = vmatpush3.bf16.msra.mxu0 %v2682_v23 }
 0x1c1   : > { %v2629_v47 = vpop.eup %2136  ;;  %v884_v61 = vmul.f32 1.442695, %v853_v11 }
 0x1c2   : > { %v2631_v0 = vpop.eup %2138  ;;  %904 = vadd.xlane.f32.xlu1 %v2629_v47  ;;  %2018 = vmatprep.subr.bf16.mxu1 %v2017_v50 }
 0x1c3   : > { %2148 = vpow2.f32 %v884_v61  ;;  %906 = vadd.xlane.f32.xlu0 %v2631_v0  ;;  %1954 = vmatmul.mubr.msk.f32.vlgmr.msra.gmra.mrb[16].mxu0 %vm396_vm0, %v2424_v29 }
 0x1c4   : > { %2020 = vmatpush3.bf16.msra.mxu1 %v2017_v50  ;;  %1956 = vmatprep.mubr.msk.f32.mxu0 %vm396_vm0, %v2427_v30 }
 0x1c5   : > { %v2641_v4 = vpop.eup %2140  ;;  %2022 = vmatprep.subr.bf16.mxu1 %v2021_v54 }
 0x1c6   : > { %v2643_v5 = vpop.eup %2142  ;;  %908 = vadd.xlane.f32.xlu1 %v2641_v4 }
 0x1c7   : > { %910 = vadd.xlane.f32.xlu0 %v2643_v5  ;;  %1957 = vmatmul.mubr.msk.f32.gmra.mrb[18].mxu0 %vm396_vm0, %v2434_v31 }
 0x1c8   : > { %2024 = vmatpush3.bf16.msra.mxu1 %v2021_v54  ;;  %1959 = vmatprep.mubr.msk.f32.mxu0 %vm396_vm0, %v2437_v32 }
 0x1c9   : > { %v2653_v55 = vpop.eup %2144  ;;  %2026 = vmatprep.subr.bf16.mxu1 %v2025_v18 }
 0x1ca   : > { %v2655_v58 = vpop.eup %2146  ;;  %912 = vadd.xlane.f32.xlu1 %v2653_v55 }
 0x1cb   : > { %914 = vadd.xlane.f32.xlu0 %v2655_v58  ;;  %1960 = vmatmul.mubr.msk.f32.gmra.mrb[20].mxu0 %vm396_vm0, %v2444_v33 }
 0x1cc   : > { %1962 = vmatprep.mubr.msk.f32.mxu0 %vm396_vm0, %v2447_v34 }
 0x1cd   : > { %v2659_v14 = vpop.eup %2148 }
 0x1ce   : > { %916 = vadd.xlane.f32.xlu1 %v2659_v14 }
 0x1cf   : > { %1963 = vmatmul.mubr.msk.f32.gmra.mrb[22].mxu0 %vm396_vm0, %v2454_v35 }
 0x1d0   : > { %1965 = vmatprep.mubr.msk.f32.mxu0 %vm396_vm0, %v2457_v36 }
 0x1d3   : > { %1966 = vmatmul.mubr.msk.f32.gmra.mrb[24].mxu0 %vm396_vm0, %v2464_v37 }
 0x1d4   : > { %1968 = vmatprep.mubr.msk.f32.mxu0 %vm396_vm0, %v2467_v38  ;;  %v1117_v38 = vld [vmem:[%s2931_s7 + $0x10] sm:$0xff] }
 0x1d7   : > { %1969 = vmatmul.mubr.msk.f32.gmra.mrb[26].mxu0 %vm396_vm0, %v2474_v39  ;;  %v1118_v39 = vld [vmem:[%s2931_s7 + $0x18] sm:$0xff] }
 0x1d8   : > { %1971 = vmatprep.mubr.msk.f32.mxu0 %vm396_vm0, %v2477_v40 }
 0x1db   : > { %1972 = vmatmul.mubr.msk.f32.gmra.mrb[28].mxu0 %vm396_vm0, %v2484_v41 }
 0x23b   : > { %v887_v29 = vpop.xlane.xlu0 %886 }
 0x23c   : > { %2150 = vrcp.f32 %v887_v29 }
 0x23f   : > { %v889_v30 = vpop.xlane.xlu1 %888 }
 0x240   : > { %2152 = vrcp.f32 %v889_v30  ;;  %v891_v31 = vpop.xlane.xlu0 %890 }
 0x241   : > { %2154 = vrcp.f32 %v891_v31 }
 0x243   : > { %v893_v32 = vpop.xlane.xlu1 %892 }
 0x244   : > { %2156 = vrcp.f32 %v893_v32  ;;  %v895_v33 = vpop.xlane.xlu0 %894 }
 0x245   : > { %2158 = vrcp.f32 %v895_v33 }
 0x246   : > { %v2151_v34 = vpop.eup %2150 }
 0x247   : > { %v897_v35 = vpop.xlane.xlu1 %896  ;;  %v2715_v36 = vmul.f32 %v2151_v34, %v2581_v51  ;;  %v2029_v51 = vpack.c.bf16 %v1118_v39, %v1117_v38 }
 0x248   : > { %2160 = vrcp.f32 %v897_v35  ;;  %v899_v37 = vpop.xlane.xlu0 %898 }
 0x249   : > { %2162 = vrcp.f32 %v899_v37  ;;  %1889 = vmatprep.mubr.f32.mxu1 %v2715_v36 }
 0x24a   : > { %v2153_v40 = vpop.eup %2152 }
 0x24b   : > { %v2155_v41 = vpop.eup %2154  ;;  %v901_v2 = vpop.xlane.xlu1 %900  ;;  %v2725_v24 = vmul.f32 %v2153_v40, %v2586_v13 }
 0x24c   : > { %2164 = vrcp.f32 %v901_v2  ;;  %v903_v25 = vpop.xlane.xlu0 %902  ;;  %v2728_v27 = vmul.f32 %v2155_v41, %v2588_v59 }
 0x24d   : > { %2166 = vrcp.f32 %v903_v25  ;;  %1890 = vmatmul.mubr.f32.vlgmr.msra.gmra.mrb[0].mxu1 %v2725_v24 }
 0x24e   : > { %v2157_v28 = vpop.eup %2156  ;;  %1892 = vmatprep.mubr.f32.mxu1 %v2728_v27  ;;  %2028 = vmatpush3.bf16.msra.mxu1 %v2025_v18 }
 0x24f   : > { %v2159_v44 = vpop.eup %2158  ;;  %v905_v6 = vpop.xlane.xlu1 %904  ;;  %v2733_v7 = vmul.f32 %v2157_v28, %v2594_v62  ;;  %2030 = vmatprep.subr.bf16.mxu1 %v2029_v51 }
 0x250   : > { %2168 = vrcp.f32 %v905_v6  ;;  %v907_v13 = vpop.xlane.xlu0 %906  ;;  %v2736_v45 = vmul.f32 %v2159_v44, %v2596_v20 }
 0x251   : > { %2170 = vrcp.f32 %v907_v13  ;;  %1893 = vmatmul.mubr.f32.gmra.mrb[2].mxu1 %v2733_v7 }
 0x252   : > { %v2161_v59 = vpop.eup %2160  ;;  %1895 = vmatprep.mubr.f32.mxu1 %v2736_v45  ;;  %2032 = vmatpush3.bf16.msra.mxu1 %v2029_v51 }
 0x253   : > { %v2163_v46 = vpop.eup %2162  ;;  %v909_v49 = vpop.xlane.xlu1 %908  ;;  %v2741_v52 = vmul.f32 %v2161_v59, %v2602_v3  ;;  %2041 = vmatprep.subr.bf16.mxu1 %v2674_v19 }
 0x254   : > { %2172 = vrcp.f32 %v909_v49  ;;  %v911_v62 = vpop.xlane.xlu0 %910  ;;  %v2745_v10 = vmul.f32 %v2163_v46, %v2604_v26 }
 0x255   : > { %2174 = vrcp.f32 %v911_v62  ;;  %1896 = vmatmul.mubr.f32.gmra.mrb[4].mxu1 %v2741_v52 }
 0x256   : > { %v2165_v20 = vpop.eup %2164  ;;  %1898 = vmatprep.mubr.f32.mxu1 %v2745_v10 }
 0x257   : > { %v2167_v11 = vpop.eup %2166  ;;  %v913_v56 = vpop.xlane.xlu1 %912  ;;  %v2750_v57 = vmul.f32 %v2165_v20, %v2616_v48 }
 0x258   : > { %2176 = vrcp.f32 %v913_v56  ;;  %v915_v3 = vpop.xlane.xlu0 %914  ;;  %v2753_v60 = vmul.f32 %v2167_v11, %v2618_v53 }
 0x259   : > { %2178 = vrcp.f32 %v915_v3  ;;  %1899 = vmatmul.mubr.f32.gmra.mrb[6].mxu1 %v2750_v57 }
 0x25a   : > { %v2169_v26 = vpop.eup %2168  ;;  %1901 = vmatprep.mubr.f32.mxu1 %v2753_v60 }
 0x25b   : > { %v2171_v61 = vpop.eup %2170  ;;  %v917_v12 = vpop.xlane.xlu1 %916  ;;  %v2758_v1 = vmul.f32 %v2169_v26, %v2629_v47 }
 0x25c   : > { %2180 = vrcp.f32 %v917_v12  ;;  %v2761_v48 = vmul.f32 %v2171_v61, %v2631_v0 }
 0x25d   : > { %1902 = vmatmul.mubr.f32.gmra.mrb[8].mxu1 %v2758_v1 }
 0x25e   : > { %v2173_v50 = vpop.eup %2172  ;;  %1904 = vmatprep.mubr.f32.mxu1 %v2761_v48 }
 0x25f   : > { %v2175_v53 = vpop.eup %2174  ;;  %v2766_v8 = vmul.f32 %v2173_v50, %v2641_v4 }
 0x260   : > { %v2769_v9 = vmul.f32 %v2175_v53, %v2643_v5 }
 0x261   : > { %1905 = vmatmul.mubr.f32.gmra.mrb[10].mxu1 %v2766_v8 }
 0x262   : > { %v2177_v47 = vpop.eup %2176  ;;  %1907 = vmatprep.mubr.f32.mxu1 %v2769_v9 }
 0x263   : > { %v2179_v54 = vpop.eup %2178  ;;  %v2774_v0 = vmul.f32 %v2177_v47, %v2653_v55 }
 0x264   : > { %v2777_v15 = vmul.f32 %v2179_v54, %v2655_v58 }
 0x265   : > { %1908 = vmatmul.mubr.f32.gmra.mrb[12].mxu1 %v2774_v0 }
 0x266   : > { %v2181_v16 = vpop.eup %2180  ;;  %1910 = vmatprep.mubr.f32.mxu1 %v2777_v15 }
 0x267   : > { %v2782_v4 = vmul.f32 %v2181_v16, %v2659_v14 }
 0x269   : > { %1911 = vmatmul.mubr.f32.gmra.mrb[14].mxu1 %v2782_v4 }
 0x296   : > { %v1955_v34 = vpop.f32.mrb[16].mxu0 }
 0x297   : > { %v1378_v35 = vpop.f32.mrb[17].mxu0 }
 0x29a   : > { %v1958_v37 = vpop.f32.mrb[18].mxu0 }
 0x29b   : > { %v1388_v38 = vpop.f32.mrb[19].mxu0 }
 0x29e   : > { %v1961_v39 = vpop.f32.mrb[20].mxu0 }
 0x29f   : > { %v1398_v40 = vpop.f32.mrb[21].mxu0 }
 0x2a2   : > { %v1964_v41 = vpop.f32.mrb[22].mxu0 }
 0x2a3   : > { %v1408_v2 = vpop.f32.mrb[23].mxu0 }
 0x2a6   : > { %v1967_v51 = vpop.f32.mrb[24].mxu0 }
 0x2a7   : > { %v1418_v25 = vpop.f32.mrb[25].mxu0 }
 0x2aa   : > { %v1970_v28 = vpop.f32.mrb[26].mxu0 }
 0x2ab   : > { %v1428_v44 = vpop.f32.mrb[27].mxu0 }
 0x2ae   : > { %v2808_v6 = vpop.f32.mrb[28].mxu0 }
 0x320   : > { %v1891_v5 = vpop.f32.mrb[0].mxu1 }
 0x321   : > { %v1032_v17 = vpop.f32.mrb[1].mxu1 }
 0x322   : > { %1921 = vmatprep.mubr.msk.f32.mxu1 %vm396_vm0, %v1032_v17 }
 0x323   : > { %1922 = vmatmul.mubr.msk.f32.vlgmr.msra.gmra.mrb[16].mxu1 %vm396_vm0, %v1891_v5 }
 0x324   : > { %v1894_v55 = vpop.f32.mrb[2].mxu1  ;;  %2043 = vmatpush3.bf16.msra.mxu1 %v2674_v19 }
 0x325   : > { %v1042_v58 = vpop.f32.mrb[3].mxu1  ;;  %2042 = vmatprep.subr.bf16.mxu1 %v2682_v23 }
 0x326   : > { %1924 = vmatprep.mubr.msk.f32.mxu1 %vm396_vm0, %v1042_v58 }
 0x327   : > { %1925 = vmatmul.mubr.msk.f32.gmra.mrb[18].mxu1 %vm396_vm0, %v1894_v55 }
 0x328   : > { %v1897_v14 = vpop.f32.mrb[4].mxu1  ;;  %2044 = vmatpush3.bf16.msra.mxu1 %v2682_v23 }
 0x329   : > { %v1052_v18 = vpop.f32.mrb[5].mxu1 }
 0x32a   : > { %1927 = vmatprep.mubr.msk.f32.mxu1 %vm396_vm0, %v1052_v18 }
 0x32b   : > { %1928 = vmatmul.mubr.msk.f32.gmra.mrb[20].mxu1 %vm396_vm0, %v1897_v14 }
 0x32c   : > { %v1900_v63 = vpop.f32.mrb[6].mxu1 }
 0x32d   : > { %v1062_v21 = vpop.f32.mrb[7].mxu1 }
 0x32e   : > { %1930 = vmatprep.mubr.msk.f32.mxu1 %vm396_vm0, %v1062_v21 }
 0x32f   : > { %1931 = vmatmul.mubr.msk.f32.gmra.mrb[22].mxu1 %vm396_vm0, %v1900_v63 }
 0x330   : > { %v1903_v19 = vpop.f32.mrb[8].mxu1 }
 0x331   : > { %v1072_v22 = vpop.f32.mrb[9].mxu1 }
 0x332   : > { %1933 = vmatprep.mubr.msk.f32.mxu1 %vm396_vm0, %v1072_v22 }
 0x333   : > { %1934 = vmatmul.mubr.msk.f32.gmra.mrb[24].mxu1 %vm396_vm0, %v1903_v19 }
 0x334   : > { %v1906_v29 = vpop.f32.mrb[10].mxu1 }
 0x335   : > { %v1082_v30 = vpop.f32.mrb[11].mxu1 }
 0x336   : > { %1936 = vmatprep.mubr.msk.f32.mxu1 %vm396_vm0, %v1082_v30 }
 0x337   : > { %1937 = vmatmul.mubr.msk.f32.gmra.mrb[26].mxu1 %vm396_vm0, %v1906_v29 }
 0x338   : > { %v1909_v23 = vpop.f32.mrb[12].mxu1 }
 0x339   : > { %v1092_v31 = vpop.f32.mrb[13].mxu1 }
 0x33a   : > { %1939 = vmatprep.mubr.msk.f32.mxu1 %vm396_vm0, %v1092_v31 }
 0x33b   : > { %1940 = vmatmul.mubr.msk.f32.gmra.mrb[28].mxu1 %vm396_vm0, %v1909_v23 }
 0x33c   : > { %v1912_v32 = vpop.f32.mrb[14].mxu1 }
 0x33d   : > { %v1102_v33 = vpop.f32.mrb[15].mxu1 }
 0x33e   : > { %1942 = vmatprep.mubr.msk.f32.mxu1 %vm396_vm0, %v1102_v33 }
 0x33f   : > { %1943 = vmatmul.mubr.msk.f32.gmra.mrb[30].mxu1 %vm396_vm0, %v1912_v32 }
 0x340   : > { %1974 = vmatprep.mubr.msk.f32.mxu1 %vm396_vm0, %v2487_v42  ;;  %v2810_v42 = vpop.f32.mrb[29].mxu0 }
 0x347   : > { %1975 = vmatmul.mubr.msk.f32.vlgmr.msra.gmra.mrb[30].mxu1 %vm396_vm0, %v2494_v43  ;;  %v2816_v43 = vld [vmem:[%s2932_s8] ss:$0 sm:$0xff] }
 0x3f6   : > { %v1923_v13 = vpop.f32.mrb[16].mxu1 }
 0x3f7   : > { %v1384_v59 = vadd.f32 %v1955_v34, %v1923_v13  ;;  %v1233_v46 = vpop.f32.mrb[17].mxu1 }
 0x3f8   : > { %v1379_v49 = vadd.f32 %v1378_v35, %v1233_v46 }
 0x3f9   : > { %v1465_v62 = vadd.f32 %v2816_v43, %v1384_v59 }
 0x3fa   : > { %v1464_v20 = vadd.f32 %v2816_v43, %v1379_v49  ;;  %v1926_v11 = vpop.f32.mrb[18].mxu1 }
 0x3fb   : > { %v1481_v56 = vadd.f32 %v1465_v62, %v2725_v24  ;;  %v1394_v3 = vadd.f32 %v1958_v37, %v1926_v11  ;;  %v1243_v26 = vpop.f32.mrb[19].mxu1 }
 0x3fc   : > { %v1480_v61 = vadd.f32 %v1464_v20, %v2715_v36  ;;  %v1389_v12 = vadd.f32 %v1388_v38, %v1243_v26 }
 0x3fd   : > { %1497 = vst [vmem:[%s2824_s28 + $0x8] sm:$0xff] %v1481_v56  ;;  %v1467_v50 = vadd.f32 %v2816_v43, %v1394_v3 }
 0x3fe   : > { %1496 = vst [vmem:[%s2824_s28] sm:$0xff] %v1480_v61  ;;  %v1466_v53 = vadd.f32 %v2816_v43, %v1389_v12  ;;  %v1929_v47 = vpop.f32.mrb[20].mxu1 }
 0x3ff   : > { %v1483_v24 = vadd.f32 %v1467_v50, %v2733_v7  ;;  %v1404_v54 = vadd.f32 %v1961_v39, %v1929_v47  ;;  %v1253_v36 = vpop.f32.mrb[21].mxu1 }
 0x400   : > { %v1482_v16 = vadd.f32 %v1466_v53, %v2728_v27  ;;  %v1399_v5 = vadd.f32 %v1398_v40, %v1253_v36 }
 0x401   : > { %1499 = vst [vmem:[%s2824_s28 + $0x18] sm:$0xff] %v1483_v24  ;;  %v1469_v17 = vadd.f32 %v2816_v43, %v1404_v54 }
 0x402   : > { %1498 = vst [vmem:[%s2824_s28 + $0x10] sm:$0xff] %v1482_v16  ;;  %v1468_v55 = vadd.f32 %v2816_v43, %v1399_v5  ;;  %v1932_v58 = vpop.f32.mrb[22].mxu1 }
 0x403   : > { %v1485_v14 = vadd.f32 %v1469_v17, %v2741_v52  ;;  %v1414_v18 = vadd.f32 %v1964_v41, %v1932_v58  ;;  %v1263_v63 = vpop.f32.mrb[23].mxu1 }
 0x404   : > { %v1484_v7 = vadd.f32 %v1468_v55, %v2736_v45  ;;  %v1409_v21 = vadd.f32 %v1408_v2, %v1263_v63 }
 0x405   : > { %1501 = vst [vmem:[%s2824_s28 + $0x28] sm:$0xff] %v1485_v14  ;;  %v1471_v27 = vadd.f32 %v2816_v43, %v1414_v18 }
 0x406   : > { %1500 = vst [vmem:[%s2824_s28 + $0x20] sm:$0xff] %v1484_v7  ;;  %v1470_v19 = vadd.f32 %v2816_v43, %v1409_v21  ;;  %v1935_v22 = vpop.f32.mrb[24].mxu1 }
 0x407   : > { %v1487_v29 = vadd.f32 %v1471_v27, %v2750_v57  ;;  %v1424_v30 = vadd.f32 %v1967_v51, %v1935_v22  ;;  %v1273_v23 = vpop.f32.mrb[25].mxu1 }
 0x408   : > { %v1486_v52 = vadd.f32 %v1470_v19, %v2745_v10  ;;  %v1419_v31 = vadd.f32 %v1418_v25, %v1273_v23 }
 0x409   : > { %1503 = vst [vmem:[%s2824_s28 + $0x38] sm:$0xff] %v1487_v29  ;;  %v1473_v45 = vadd.f32 %v2816_v43, %v1424_v30 }
 0x40a   : > { %1502 = vst [vmem:[%s2824_s28 + $0x30] sm:$0xff] %v1486_v52  ;;  %v1472_v32 = vadd.f32 %v2816_v43, %v1419_v31  ;;  %v1938_v33 = vpop.f32.mrb[26].mxu1 }
 0x40b   : > { %v1489_v34 = vadd.f32 %v1473_v45, %v2758_v1  ;;  %v1434_v35 = vadd.f32 %v1970_v28, %v1938_v33  ;;  %v1283_v37 = vpop.f32.mrb[27].mxu1 }
 0x40c   : > { %v1488_v57 = vadd.f32 %v1472_v32, %v2753_v60  ;;  %v1429_v38 = vadd.f32 %v1428_v44, %v1283_v37 }
 0x40d   : > { %1505 = vst [vmem:[%s2824_s28 + $0x48] sm:$0xff] %v1489_v34  ;;  %v1475_v10 = vadd.f32 %v2816_v43, %v1434_v35 }
 0x40e   : > { %1504 = vst [vmem:[%s2824_s28 + $0x40] sm:$0xff] %v1488_v57  ;;  %v1474_v39 = vadd.f32 %v2816_v43, %v1429_v38  ;;  %v1941_v40 = vpop.f32.mrb[28].mxu1 }
 0x40f   : > { %v1491_v41 = vadd.f32 %v1475_v10, %v2766_v8  ;;  %v1444_v1 = vadd.f32 %v2808_v6, %v1941_v40  ;;  %v1293_v2 = vpop.f32.mrb[29].mxu1 }
 0x410   : > { %v1490_v51 = vadd.f32 %v1474_v39, %v2761_v48  ;;  %v1439_v60 = vadd.f32 %v2810_v42, %v1293_v2 }
 0x411   : > { %1507 = vst [vmem:[%s2824_s28 + $0x58] sm:$0xff] %v1491_v41  ;;  %v1477_v25 = vadd.f32 %v2816_v43, %v1444_v1 }
 0x412   : > { %1506 = vst [vmem:[%s2824_s28 + $0x50] sm:$0xff] %v1490_v51  ;;  %v1476_v28 = vadd.f32 %v2816_v43, %v1439_v60 }
 0x413   : > { %v1493_v44 = vadd.f32 %v1477_v25, %v2774_v0 }
 0x414   : > { %v1492_v8 = vadd.f32 %v1476_v28, %v2769_v9 }
 0x415   : > { %1509 = vst [vmem:[%s2824_s28 + $0x68] sm:$0xff] %v1493_v44 }
 0x416   : > { %1508 = vst [vmem:[%s2824_s28 + $0x60] sm:$0xff] %v1492_v8 }
 0x41a   : > { %v1976_v6 = vpop.f32.mrb[30].mxu1 }
 0x41b   : > { %v1479_v48 = vadd.f32 %v1976_v6, %v2816_v43  ;;  %v1448_v42 = vpop.f32.mrb[31].mxu1 }
 0x41c   : > { %v1478_v13 = vadd.f32 %v2816_v43, %v1448_v42 }
 0x41d   : > { %v1495_v59 = vadd.f32 %v1479_v48, %v2782_v4 }
 0x41e   : > { %v1494_v9 = vadd.f32 %v1478_v13, %v2777_v15 }
 0x41f   : > { %1511 = vst [vmem:[%s2824_s28 + $0x78] sm:$0xff] %v1495_v59 }
 0x420   : > { %1510 = vst [vmem:[%s2824_s28 + $0x70] sm:$0xff] %v1494_v9 }
 0x421   : > { %2195 = shalt.err (!%p2192_p3)
}
 0x422   : > { %s2196_s23 = scalar_lea.hbm %s2874_s21, 2048  ;;  %s2200_s29 = scalar_lea.hbm %s2933_s9, 4096 }
 0x423   : > { %p2197_p4 = scmp.ne.s32.totalorder %s2874_s21, %s2196_s23  ;;  %p2201_p9 = scmp.lt.u32.totalorder %s2874_s21, %s2933_s9 }
 0x424   : > { %p2202_p10 = scmp.lt.u32.totalorder %s2200_s29, %s2196_s23  ;;  %p2204_p12 = scmp.lt.u32.totalorder %s2196_s23, %s2874_s21 }
 0x425   : > { %p2198_p7 = pnand %p2197_p4, %p2337_p5 }
 0x426   : > { %p2203_p11 = por %p2202_p10, %p2201_p9 }
 0x427   : > { %p2199_p8 = pneg %p2198_p7 }
 0x428   : > { %p2205_p13 = por %p2204_p12, %p2203_p11 }
 0x42a   : > { %p2206_p0 = pnand %p2205_p13, %p2199_p8 }
 0x42c   : > { %2209 = shalt.err (!%p2206_p0)
}
 0x42d   : > { %s2247_s27 = smov 128   ;;  %s2248_s22 = smov 8  }
 0x42e   : > { %2077 = dma.vmem_to_hbm [thread:$0]  (%p2337_p5), %s2876_s14, 2048, %s2874_s21, %s2883_s13, %s2247_s27, %s2247_s27, %s2248_s22  }
 0x42f PF: > { %p2083_p1 = scmp.ge.s32.totalorder %s2244_s12, 2  ;;  %s1541_s24 = sand.u32 1, %s2232_s30  }
 0x430   : > { %s1542_s25 = scalar_lea.sflag [#allocation3], %s1541_s24 }
 0x431   : > { %p2080_p2 = pnand %p2083_p1, %p2341_p6 }
 0x433   : > { %2227 = dma.done.wait (!%p2080_p2), %s1542_s25, 2048  }
 0x434   : > { %2229 = vsyncadd (!%p2080_p2), %s1542_s25, 4294965248  ;;  %p19_p3 = scmp.ge.s32.totalorder %s2324_s15, 4   ;;  %s2936_s30 = smov %s2236_s10 }
 0x435   : > { %s2937_s10 = smov %s2240_s11  ;;  %s2938_s11 = smov %s2335_s18 }
 0x436   : > { %s2939_s12 = smov %s2324_s15  ;;  %21 = sbr.rel (!%p19_p3) target bundleno = 3 (0x3), region = 94 }
 0x43d   :  { %1547 = vsyncpa [#allocation3], 1 }
 0x43e   :  { %1549 = vsyncpa [#allocation3 + $0x1], 1 }

</bundles_post_ra>
